<compile_context>
chip_gen: v7x
topology: tpu7x:2x2x1
jax: 0.10.0
libtpu: 0.0.40
codegen_flags: <defaults>
</compile_context>

<pallas_src>
import functools

import jax
import jax.numpy as jnp
import numpy as np
from jax.experimental import pallas as pl
from jax.experimental.pallas import tpu as pltpu


# ---------------------------------------------------------------------------
# Pallas kernel: single invocation, fused MLP matmuls + energy on-chip.
#   x     : (Np, F+A)      fused [feature | action] rows (Np = padded B*T)
#   delta : (Np, S*F)      lane-dense delta-feature slab
#   w1    : (F+A, H), b1: (1, H)
#   w2    : (H, 2*S*F), b2: (1, 2*S*F)   pre-tiled [mu-head | prec-head]
#   out   : (Np, S*F)      lane-dense energy slab
# ---------------------------------------------------------------------------
def _energy_kernel(x_ref, delta_ref, w1_ref, b1_ref, w2_ref, b2_ref, out_ref,
                   *, sf):
    # hidden layer: one fused MXU matmul, f32 accumulation
    h = jnp.dot(x_ref[...], w1_ref[...], preferred_element_type=jnp.float32)
    h = jnp.maximum(h + b1_ref[...], 0.0)                       # (Np, H)

    # fused heads: one MXU matmul producing [mu_tiled | prec_logit_tiled]
    heads = jnp.dot(h, w2_ref[...], preferred_element_type=jnp.float32)
    heads = heads + b2_ref[...]                                 # (Np, 2*S*F)

    mu = heads[:, :sf]                                          # (Np, S*F)
    prec = jax.nn.softplus(heads[:, sf:])                       # (Np, S*F), EUP path

    diff = delta_ref[...] - mu                                  # (Np, S*F)
    out_ref[...] = -prec * diff * diff                          # unmasked lane-dense store


def _energy_pallas(x, deltas_flat, w1, b1, w2, b2, sf):
    n_pad = x.shape[0]
    kernel = functools.partial(_energy_kernel, sf=sf)
    vmem_spec = pl.BlockSpec(memory_space=pltpu.MemorySpace.VMEM)
    return pl.pallas_call(
        kernel,
        out_shape=jax.ShapeDtypeStruct((n_pad, sf), jnp.float32),
        in_specs=[vmem_spec] * 6,
        out_specs=vmem_spec,
    )(x, deltas_flat, w1, b1, w2, b2)


# ---------------------------------------------------------------------------
# forward / forward_with_feature (glue in plain JAX)
# ---------------------------------------------------------------------------
def contrastive_forward(obs, actions, next_obses, neg_delta_features, params):
    """
    obs:                 (B, F)            -- encoder is identity (continuous state)
    actions:             (B, T, A)
    next_obses:          (B, T, F)
    neg_delta_features:  (B, T, K, F)
    returns energy:      (B, T, 1+K, F)
    """
    B, T, F = next_obses.shape
    A = actions.shape[-1]
    K = neg_delta_features.shape[2]
    S = 1 + K

    feature = obs                      # encoder = identity
    next_features = next_obses         # encoder = identity

    # gradient_through_pred_steps = False: feature for step i>0 is next_features[:, i-1]
    feats_per_step = jnp.concatenate(
        [feature[:, None, :], next_features[:, :-1, :]], axis=1)        # (B, T, F)
    pos_delta = next_features - feats_per_step                          # (B, T, F)
    deltas = jnp.concatenate(
        [pos_delta[:, :, None, :], neg_delta_features], axis=2)         # (B, T, S, F)

    # Fold pred steps into the batch dimension; fuse feature|action rows and
    # flatten the (S, F) sample axes into a single lane-dense last dim.
    N = B * T
    x = jnp.concatenate([feats_per_step, actions], axis=-1).reshape(N, F + A)
    deltas_flat = deltas.reshape(N, S * F)

    # Pack/fuse weights (tiny; done in the wrapper — could be cached at init).
    w1 = jnp.concatenate([params["w1f"], params["w1a"]], axis=0)         # (F+A, H)
    b1 = params["b1"]                                                    # (1, H)
    w2 = jnp.concatenate([jnp.tile(params["wmu"], (1, S)),
                          jnp.tile(params["wp"], (1, S))], axis=1)       # (H, 2*S*F)
    b2 = jnp.concatenate([jnp.tile(params["bmu"], (1, S)),
                          jnp.tile(params["bp"], (1, S))], axis=1)       # (1, 2*S*F)

    # Pad rows to a multiple of 8 sublanes.
    n_pad = ((N + 7) // 8) * 8
    pad = n_pad - N
    if pad:
        x = jnp.pad(x, ((0, pad), (0, 0)))
        deltas_flat = jnp.pad(deltas_flat, ((0, pad), (0, 0)))

    energy_flat = _energy_pallas(x, deltas_flat, w1, b1, w2, b2, S * F)
    return energy_flat[:N].reshape(B, T, S, F)


def nce_loss(energy):
    """energy: (B, T, 1+K, F) -> scalar (matches Contrastive.nce_loss, ndim==4)."""
    log_p = jax.nn.log_softmax(energy, axis=-2)
    return jnp.mean(-jnp.sum(log_p[..., 0, :], axis=(-2, -1)))


# Pure-JAX reference of the same concrete model (used only for a self-check).
def _reference_forward(obs, actions, next_obses, neg_delta_features, params):
    feature = obs
    next_features = next_obses
    feats_per_step = jnp.concatenate(
        [feature[:, None, :], next_features[:, :-1, :]], axis=1)
    pos_delta = next_features - feats_per_step
    deltas = jnp.concatenate(
        [pos_delta[:, :, None, :], neg_delta_features], axis=2)         # (B,T,S,F)

    h = jnp.maximum(
        feats_per_step @ params["w1f"] + actions @ params["w1a"] + params["b1"], 0.0)
    mu = h @ params["wmu"] + params["bmu"]                              # (B,T,F)
    prec = jax.nn.softplus(h @ params["wp"] + params["bp"])             # (B,T,F)
    diff = deltas - mu[:, :, None, :]
    return -prec[:, :, None, :] * diff * diff


# TODO(synk): gradient_through_pred_steps=True branch (gumbel_softmax feature
# rollout), Categorical sampling in predict_step_with_feature, optimizer /
# checkpoint load are training-time constructs and are not part of this
# forward kernel.


# ---------------------------------------------------------------------------
# deterministic parameter init + example run
# ---------------------------------------------------------------------------
def init_params(key, feature_dim, action_dim, hidden_dim):
    ks = jax.random.split(key, 6)
    s = 0.1
    return {
        "w1f": s * jax.random.normal(ks[0], (feature_dim, hidden_dim), jnp.float32),
        "w1a": s * jax.random.normal(ks[1], (action_dim, hidden_dim), jnp.float32),
        "b1": jnp.zeros((1, hidden_dim), jnp.float32),
        "wmu": s * jax.random.normal(ks[2], (hidden_dim, feature_dim), jnp.float32),
        "bmu": jnp.zeros((1, feature_dim), jnp.float32),
        "wp": s * jax.random.normal(ks[3], (hidden_dim, feature_dim), jnp.float32),
        "bp": jnp.zeros((1, feature_dim), jnp.float32),
    }


if __name__ == "__main__":
    B, T, F, A, K, H = 2, 2, 32, 8, 7, 64   # batch, pred steps, feature, action, negatives, hidden

    key = jax.random.PRNGKey(0)
    k_obs, k_act, k_next, k_neg, k_par = jax.random.split(key, 5)

    obs = jax.random.normal(k_obs, (B, F), jnp.float32)
    actions = jax.random.normal(k_act, (B, T, A), jnp.float32)
    next_obses = jax.random.normal(k_next, (B, T, F), jnp.float32)

    # mimic sample_delta_feature: uniform noise scaled into a delta range
    delta_min, delta_max = -1.0, 1.0
    u = jax.random.uniform(k_neg, (B, T, K, F), jnp.float32)
    neg_delta_feature = u * (delta_max - delta_min) + delta_min

    params = init_params(k_par, F, A, H)

    energy = contrastive_forward(obs, actions, next_obses, neg_delta_feature, params)
    energy = jax.block_until_ready(energy)
    assert energy.shape == (B, T, 1 + K, F), energy.shape

    ref = jax.block_until_ready(
        _reference_forward(obs, actions, next_obses, neg_delta_feature, params))
    np.testing.assert_allclose(np.asarray(energy), np.asarray(ref),
                               rtol=1e-4, atol=1e-4)

    loss = jax.block_until_ready(nce_loss(energy))
    assert jnp.isfinite(loss)

    print("KERNEL_OK")
</pallas_src>

<mosaic_0001>
module attributes {stable_mosaic.version = 11 : i64} {
  func.func @_energy_kernel(%arg0: memref<8x40xf32, #tpu.memory_space<vmem>>, %arg1: memref<8x256xf32, #tpu.memory_space<vmem>>, %arg2: memref<40x64xf32, #tpu.memory_space<vmem>>, %arg3: memref<1x64xf32, #tpu.memory_space<vmem>>, %arg4: memref<64x512xf32, #tpu.memory_space<vmem>>, %arg5: memref<1x512xf32, #tpu.memory_space<vmem>>, %arg6: memref<8x256xf32, #tpu.memory_space<vmem>>) attributes {dimension_semantics = [], scalar_prefetch = 0 : i64, scratch_operands = 0 : i64, tpu.core_type = #tpu.core_type<tc>} {
    %c0 = arith.constant 0 : index
    %c0_0 = arith.constant 0 : index
    %0 = vector.load %arg0[%c0, %c0_0] : memref<8x40xf32, #tpu.memory_space<vmem>>, vector<8x40xf32>
    %c0_1 = arith.constant 0 : index
    %c0_2 = arith.constant 0 : index
    %1 = vector.load %arg2[%c0_1, %c0_2] : memref<40x64xf32, #tpu.memory_space<vmem>>, vector<40x64xf32>
    %cst = arith.constant dense<0.000000e+00> : vector<8x64xf32>
    %2 = tpu.matmul %0, %1, %cst {dimension_numbers = #tpu.dot_dimension_numbers<[1], [0], [0], [1], [0, 0, 1, 1], [], []>} : vector<8x40xf32>, vector<40x64xf32>, vector<8x64xf32> -> vector<8x64xf32>
    %c0_3 = arith.constant 0 : index
    %c0_4 = arith.constant 0 : index
    %3 = vector.load %arg3[%c0_3, %c0_4] : memref<1x64xf32, #tpu.memory_space<vmem>>, vector<1x64xf32>
    %4 = vector.broadcast %3 : vector<1x64xf32> to vector<8x64xf32>
    %5 = arith.addf %2, %4 : vector<8x64xf32>
    %cst_5 = arith.constant 0.000000e+00 : f32
    %6 = vector.broadcast %cst_5 : f32 to vector<8x64xf32>
    %7 = arith.maximumf %5, %6 : vector<8x64xf32>
    %c0_6 = arith.constant 0 : index
    %c0_7 = arith.constant 0 : index
    %8 = vector.load %arg4[%c0_6, %c0_7] : memref<64x512xf32, #tpu.memory_space<vmem>>, vector<64x512xf32>
    %cst_8 = arith.constant dense<0.000000e+00> : vector<8x512xf32>
    %9 = tpu.matmul %7, %8, %cst_8 {dimension_numbers = #tpu.dot_dimension_numbers<[1], [0], [0], [1], [0, 0, 1, 1], [], []>} : vector<8x64xf32>, vector<64x512xf32>, vector<8x512xf32> -> vector<8x512xf32>
    %c0_9 = arith.constant 0 : index
    %c0_10 = arith.constant 0 : index
    %10 = vector.load %arg5[%c0_9, %c0_10] : memref<1x512xf32, #tpu.memory_space<vmem>>, vector<1x512xf32>
    %11 = vector.broadcast %10 : vector<1x512xf32> to vector<8x512xf32>
    %12 = arith.addf %9, %11 : vector<8x512xf32>
    %13 = vector.extract_strided_slice %12 {offsets = [0, 0], sizes = [8, 256], strides = [1, 1]} : vector<8x512xf32> to vector<8x256xf32>
    %14 = vector.extract_strided_slice %12 {offsets = [0, 256], sizes = [8, 256], strides = [1, 1]} : vector<8x512xf32> to vector<8x256xf32>
    %cst_11 = arith.constant 0.000000e+00 : f32
    %15 = vector.broadcast %cst_11 : f32 to vector<8x256xf32>
    %16 = arith.maximumf %14, %15 : vector<8x256xf32>
    %17 = vector.broadcast %cst_11 : f32 to vector<8x256xf32>
    %18 = arith.subf %14, %17 : vector<8x256xf32>
    %19 = arith.cmpf one, %18, %18 : vector<8x256xf32>
    %20 = vector.broadcast %cst_11 : f32 to vector<8x256xf32>
    %21 = arith.addf %14, %20 : vector<8x256xf32>
    %22 = math.absf %18 : vector<8x256xf32>
    %cst_12 = arith.constant 0.000000e+00 : f32
    %23 = vector.broadcast %cst_12 : f32 to vector<8x256xf32>
    %24 = arith.subf %23, %22 : vector<8x256xf32>
    %25 = math.exp %24 : vector<8x256xf32>
    %26 = math.log1p %25 : vector<8x256xf32>
    %27 = arith.addf %16, %26 : vector<8x256xf32>
    %28 = arith.select %19, %21, %27 : vector<8x256xi1>, vector<8x256xf32>
    %c0_13 = arith.constant 0 : index
    %c0_14 = arith.constant 0 : index
    %29 = vector.load %arg1[%c0_13, %c0_14] : memref<8x256xf32, #tpu.memory_space<vmem>>, vector<8x256xf32>
    %30 = arith.subf %29, %13 : vector<8x256xf32>
    %cst_15 = arith.constant 0.000000e+00 : f32
    %31 = vector.broadcast %cst_15 : f32 to vector<8x256xf32>
    %32 = arith.subf %31, %28 : vector<8x256xf32>
    %33 = arith.mulf %32, %30 : vector<8x256xf32>
    %34 = arith.mulf %33, %30 : vector<8x256xf32>
    %c0_16 = arith.constant 0 : index
    %c0_17 = arith.constant 0 : index
    %35 = vector.load %arg6[%c0_16, %c0_17] : memref<8x256xf32, #tpu.memory_space<vmem>>, vector<8x256xf32>
    tpu.vector_store %arg6[%c0_16, %c0_17], %34 {strides = array<i32>} : memref<8x256xf32, #tpu.memory_space<vmem>>, vector<8x256xf32>,
    return
  }
}

</mosaic_0001>

<bundles_post_ra>
// kernel: tpu_custom_call.1
= control target key start
LH: loop header
LB: loop body
LE: loop exit
PB: predicated region body
PF: predicated region fallthrough
CT: control target
= control target key end

     0   :  { %11 = vsyncpa [#allocation3], 0  ;;  %s740_s0 = inlined_call_operand.hbm [shape: f32[8,40], index: 0, kind: input, shape index: {}]   ;;  %s741_s1 = inlined_call_operand.hbm [shape: f32[8,256], index: 1, kind: input, shape index: {}]   ;;  %s742_s2 = inlined_call_operand.hbm [shape: f32[40,64], index: 2, kind: input, shape index: {}]   ;;  %s743_s3 = inlined_call_operand.vmem [shape: f32[1,64], index: 3, kind: input, shape index: {}]   ;;  %s744_s4 = inlined_call_operand.hbm [shape: f32[64,512], index: 4, kind: input, shape index: {}]   ;;  %s745_s5 = inlined_call_operand.vmem [shape: f32[1,512], index: 5, kind: input, shape index: {}]   ;;  %s746_s6 = inlined_call_operand.hbm [shape: f32[8,256], index: 6, kind: output, shape index: {}]  }
   0x1   :  { %12 = vsyncpa [#allocation6], 0 }
   0x2   :  { %13 = vsyncpa [#allocation9], 0 }
   0x3   :  { %14 = vsyncpa [#allocation4], 0  ;;  %s627_s21 = smov [#allocation5]   ;;  %s628_s23 = smov [#allocation2]  }
   0x4   :  { %s31_s22 = sshll.u32 %s627_s21, 4  ;;  %s21_s24 = sshll.u32 %s628_s23, 4  ;;  %s32_s22 = int_to_ptr.vmem [resolvable:$true] %s31_s22  ;;  %s22_s24 = int_to_ptr.vmem [resolvable:$true] %s21_s24 }
   0x5   :  { %s509_s27 = scalar_lea.hbm %s741_s1, 256 }
   0x6   :  { %p510_p0 = scmp.ne.s32.totalorder %s741_s1, %s509_s27  ;;  %p513_p1 = scmp.lt.u32.totalorder %s509_s27, %s741_s1 }
   0x8   :  { %p515_p2 = pnand %p513_p1, %p510_p0 }
   0xa   :  { %518 = shalt.err (!%p515_p2)
}
   0xb   :  { %s519_s8 = scalar_lea.vmem %s32_s22, 256  ;;  %p524_p4 = scmp.lt.s32.totalorder %s32_s22, %s32_s22 }
   0xc   :  { %p520_p3 = scmp.ne.s32.totalorder %s32_s22, %s519_s8  ;;  %p525_p5 = scmp.lt.s32.totalorder %s519_s8, %s519_s8 }
   0xe   :  { %p526_p6 = por %p525_p5, %p524_p4 }
  0x10   :  { %p527_p7 = pnand %p526_p6, %p520_p3 }
  0x12   :  { %530 = shalt.err (!%p527_p7)
}
  0x13   :  { %34 = dma.hbm_to_vmem [thread:$0]  %s741_s1, 256, %s32_s22, [#allocation6]  }
  0x14   :  { %s531_s13 = scalar_lea.hbm %s740_s0, 128 }
  0x15   :  { %p532_p8 = scmp.ne.s32.totalorder %s740_s0, %s531_s13  ;;  %p535_p9 = scmp.lt.u32.totalorder %s531_s13, %s740_s0 }
  0x17   :  { %p537_p10 = pnand %p535_p9, %p532_p8 }
  0x19   :  { %540 = shalt.err (!%p537_p10)
}
  0x1a   :  { %s541_s18 = scalar_lea.vmem %s22_s24, 128  ;;  %p546_p12 = scmp.lt.s32.totalorder %s22_s24, %s22_s24 }
  0x1b   :  { %p542_p11 = scmp.ne.s32.totalorder %s22_s24, %s541_s18  ;;  %p547_p13 = scmp.lt.s32.totalorder %s541_s18, %s541_s18 }
  0x1d   :  { %p548_p0 = por %p547_p13, %p546_p12 }
  0x1f   :  { %p549_p1 = pnand %p548_p0, %p542_p11 }
  0x21   :  { %552 = shalt.err (!%p549_p1)
}
  0x22   :  { %24 = dma.hbm_to_vmem [thread:$0]  %s740_s0, 128, %s22_s24, [#allocation3]  }
  0x23   :  { %s629_s20 = smov [#allocation7]   ;;  %s553_s25 = scalar_lea.hbm %s742_s2, 640 }
  0x24   :  { %s40_s21 = sshll.u32 %s629_s20, 4  ;;  %p554_p2 = scmp.ne.s32.totalorder %s742_s2, %s553_s25  ;;  %s41_s21 = int_to_ptr.vmem [resolvable:$true] %s40_s21 }
  0x25   :  { %p557_p3 = scmp.lt.u32.totalorder %s553_s25, %s742_s2 }
  0x27   :  { %p559_p4 = pnand %p557_p3, %p554_p2 }
  0x29   :  { %562 = shalt.err (!%p559_p4)
}
  0x2a   :  { %s563_s30 = scalar_lea.vmem %s41_s21, 640  ;;  %p568_p6 = scmp.lt.s32.totalorder %s41_s21, %s41_s21 }
  0x2b   :  { %p564_p5 = scmp.ne.s32.totalorder %s41_s21, %s563_s30  ;;  %p569_p7 = scmp.lt.s32.totalorder %s563_s30, %s563_s30 }
  0x2d   :  { %p570_p8 = por %p569_p7, %p568_p6 }
  0x2f   :  { %p571_p9 = pnand %p570_p8, %p564_p5 }
  0x31   :  { %574 = shalt.err (!%p571_p9)
}
  0x32   :  { %s630_s0 = smov 128   ;;  %s631_s24 = smov 8  }
  0x33   :  { %46 = dma.hbm_to_vmem [thread:$0]  %s742_s2, 640, %s41_s21, [#allocation6], %s630_s0, %s630_s0, %s631_s24  }
  0x34   :  { %s632_s9 = smov [#allocation8]   ;;  %s575_s13 = scalar_lea.hbm %s744_s4, 4096 }
  0x35   :  { %s54_s10 = sshll.u32 %s632_s9, 4  ;;  %p576_p10 = scmp.ne.s32.totalorder %s744_s4, %s575_s13  ;;  %s55_s10 = int_to_ptr.vmem [resolvable:$true] %s54_s10 }
  0x36   :  { %p579_p11 = scmp.lt.u32.totalorder %s575_s13, %s744_s4 }
  0x38   :  { %p581_p12 = pnand %p579_p11, %p576_p10 }
  0x3a   :  { %584 = shalt.err (!%p581_p12)
}
  0x3b   :  { %s585_s18 = scalar_lea.vmem %s55_s10, 4096  ;;  %p590_p0 = scmp.lt.s32.totalorder %s55_s10, %s55_s10 }
  0x3c   :  { %p586_p13 = scmp.ne.s32.totalorder %s55_s10, %s585_s18  ;;  %p591_p1 = scmp.lt.s32.totalorder %s585_s18, %s585_s18 }
  0x3e   :  { %p592_p2 = por %p591_p1, %p590_p0 }
  0x40   :  { %p593_p3 = pnand %p592_p2, %p586_p13 }
  0x42   :  { %596 = shalt.err (!%p593_p3)
}
  0x43   :  { %s633_s2 = smov 512   ;;  %s634_s1 = smov 32  }
  0x44   :  { %60 = dma.hbm_to_vmem [thread:$0]  %s744_s4, 4096, %s55_s10, [#allocation9], %s633_s2, %s633_s2, %s634_s1  }
  0x45   :  { %619 = dma.done.wait [#allocation3], 128  }
  0x46   :  { %620 = vsyncadd [#allocation3], 4294967168 }
  0x47   :  { %621 = dma.done.wait [#allocation6], 896  }
  0x48   :  { %622 = vsyncadd [#allocation6], 4294966400 }
  0x49   :  { %623 = dma.done.wait [#allocation9], 4096  }
  0x4a   :  { %624 = vsyncadd [#allocation9], 4294963200  ;;  %v635_v0 = vmov 0.0|0.0   ;;  %vm636_vm0 = vmmov 0   ;;  %v637_v1 = vmov 0.0   ;;  %v76_v2 = vld [vmem:[#allocation7] sm:$0xff]  ;;  %v197_v63 = vlaneseq }
  0x4b   :  { %451 = vmatprep.subr.bf16.mxu0 %v635_v0  ;;  %448 = vmatprep.mubr.msk.f32.mxu0 %vm636_vm0, %v637_v1  ;;  %v77_v3 = vld [vmem:[#allocation7 + $0x8] sm:$0xff]  ;;  %v78_v4 = vld [vmem:[#allocation7 + $0x10] sm:$0xff]  ;;  %v79_v6 = vld [vmem:[#allocation7 + $0x18] sm:$0xff]  ;;  %vm88_vm1 = vcmask 326656   ;;  %vm217_vm2 = vcmask 523264  }
  0x4c   :  { %285 = vmatprep.mubr.f32.mxu1 %v637_v1  ;;  %v452_v5 = vpack.c.bf16 %v77_v3, %v76_v2  ;;  %v164_v7 = vld [vmem:[#allocation8 + $0x8] sm:$0xff]  ;;  %v455_v9 = vpack.c.bf16 %v79_v6, %v78_v4  ;;  %v163_v11 = vld [vmem:[#allocation8] sm:$0xff]  ;;  %v166_v13 = vld [vmem:[#allocation8 + $0x18] sm:$0xff] }
  0x4d   :  { %v168_v8 = vld [vmem:[#allocation8 + $0x28] sm:$0xff]  ;;  %v167_v12 = vld [vmem:[#allocation8 + $0x20] sm:$0xff]  ;;  %v170_v14 = vld [vmem:[#allocation8 + $0x38] sm:$0xff] }
  0x4e   :  { %453 = vmatpush3.bf16.msra.mxu0 %v452_v5  ;;  %v457_v10 = vpack.c.bf16 %v168_v8, %v164_v7  ;;  %v459_v15 = vpack.c.bf16 %v167_v12, %v163_v11  ;;  %v172_v16 = vld [vmem:[#allocation8 + $0x48] sm:$0xff]  ;;  %v165_v17 = vld [vmem:[#allocation8 + $0x10] sm:$0xff]  ;;  %v174_v21 = vld [vmem:[#allocation8 + $0x58] sm:$0xff]  ;;  %v473_v29 = vpack.c.bf16 %v170_v14, %v166_v13 }
  0x4f   :  { %454 = vmatprep.subr.bf16.mxu0 %v635_v0  ;;  %v169_v18 = vld [vmem:[#allocation8 + $0x30] sm:$0xff]  ;;  %v176_v19 = vld [vmem:[#allocation8 + $0x68] sm:$0xff]  ;;  %v171_v22 = vld [vmem:[#allocation8 + $0x40] sm:$0xff]  ;;  %v198_v0 = vshrl.u32 %v197_v63, 7 }
  0x50   :  { %458 = vmatprep.subr.bf16.mxu1 %v457_v10  ;;  %v461_v20 = vpack.c.bf16 %v176_v19, %v172_v16  ;;  %v175_v23 = vld [vmem:[#allocation8 + $0x60] sm:$0xff]  ;;  %v178_v24 = vld [vmem:[#allocation8 + $0x78] sm:$0xff]  ;;  %v180_v26 = vld [vmem:[#allocation8 + $0x88] sm:$0xff]  ;;  %v475_v33 = vpack.c.bf16 %v169_v18, %v165_v17 }
  0x51   :  { %460 = vmatpush1.bf16.msra.mxu1 %v459_v15  ;;  %v463_v25 = vpack.c.bf16 %v175_v23, %v171_v22  ;;  %v184_v27 = vld [vmem:[#allocation8 + $0xa8] sm:$0xff]  ;;  %v80_v28 = vld [vmem:[#allocation7 + $0x20] sm:$0xff]  ;;  %v179_v31 = vld [vmem:[#allocation8 + $0x80] sm:$0xff]  ;;  %v477_v35 = vpack.c.bf16 %v178_v24, %v174_v21  ;;  %v211_v3 = vsub.s32 3, %v198_v0  ;;  %v199_v24 = vsub.s32 0, %v198_v0 }
  0x52   :  { %456 = vmatpush3.bf16.msra.mxu0 %v455_v9  ;;  %462 = vmatprep.subr.bf16.mxu1 %v461_v20  ;;  %v465_v30 = vpack.c.bf16 %v184_v27, %v180_v26  ;;  %v75_v32 = vld [vmem:[#allocation2] sm:$0xff]  ;;  %v173_v36 = vld [vmem:[#allocation8 + $0x50] sm:$0xff]  ;;  %v182_v39 = vld [vmem:[#allocation8 + $0x98] sm:$0xff] }
  0x53   :  { %446 = vmatprep.subr.mxu0 %v637_v1  ;;  %v183_v34 = vld [vmem:[#allocation8 + $0xa0] sm:$0xff]  ;;  %v177_v37 = vld [vmem:[#allocation8 + $0x70] sm:$0xff]  ;;  %v186_v40 = vld [vmem:[#allocation8 + $0xb8] sm:$0xff] }
  0x54   :  { %v467_v38 = vpack.c.bf16 %v183_v34, %v179_v31  ;;  %v479_v41 = vpack.c.bf16 %v177_v37, %v173_v36  ;;  %v481_v42 = vpack.c.bf16 %v186_v40, %v182_v39  ;;  %v181_v43 = vld [vmem:[#allocation8 + $0x90] sm:$0xff]  ;;  %v188_v46 = vld [vmem:[#allocation8 + $0xc8] sm:$0xff]  ;;  %v190_v48 = vld [vmem:[#allocation8 + $0xd8] sm:$0xff] }
  0x55   :  { %464 = vmatpush1.bf16.msra.mxu1 %v463_v25  ;;  %v185_v44 = vld [vmem:[#allocation8 + $0xb0] sm:$0xff]  ;;  %v192_v47 = vld [vmem:[#allocation8 + $0xe8] sm:$0xff]  ;;  %v194_v50 = vld [vmem:[#allocation8 + $0xf8] sm:$0xff]  ;;  %v203_v25 = vsub.s32 1, %v198_v0 }
  0x56   :  { %447 = vmatpush3.msra.mxu0 %v80_v28  ;;  %466 = vmatprep.subr.bf16.mxu1 %v465_v30  ;;  %v483_v45 = vpack.c.bf16 %v185_v44, %v181_v43  ;;  %v469_v49 = vpack.c.bf16 %v192_v47, %v188_v46  ;;  %v187_v51 = vld [vmem:[#allocation8 + $0xc0] sm:$0xff]  ;;  %v485_v53 = vpack.c.bf16 %v194_v50, %v190_v48  ;;  %v189_v55 = vld [vmem:[#allocation8 + $0xd0] sm:$0xff] }
  0x57   :  { %449 = vmatmul.mubr.msk.f32.vlgmr.msra.gmra.mrb[0].mxu0 %vm88_vm1, %v75_v32  ;;  %474 = vmatprep.subr.bf16.mxu0 %v473_v29  ;;  %v191_v52 = vld [vmem:[#allocation8 + $0xe0] sm:$0xff]  ;;  %v193_v56 = vld [vmem:[#allocation8 + $0xf0] sm:$0xff] }
  0x58   :  { %476 = vmatpush1.bf16.msra.mxu0 %v475_v33  ;;  %356 = vmatprep.mubr.f32.mxu0 %v637_v1  ;;  %v471_v54 = vpack.c.bf16 %v191_v52, %v187_v51  ;;  %v487_v57 = vpack.c.bf16 %v193_v56, %v189_v55  ;;  %v428_v58 = vld [vmem:[%s743_s3] ss:$0 sm:$0xff]  ;;  %v207_v1 = vsub.s32 2, %v198_v0  ;;  %v400_v46 = vld [vmem:[#allocation5 + $0x8] sm:$0xff]  ;;  %s638_s3 = smov [#allocation10]  }
  0x59   :  { %478 = vmatprep.subr.bf16.mxu0 %v477_v35  ;;  %468 = vmatpush1.bf16.msra.mxu1 %v467_v38  ;;  %v195_v2 = vld [vmem:[%s745_s5] sm:$0xf]  ;;  %s417_s5 = sshll.u32 %s638_s3, 4  ;;  %s418_s5 = int_to_ptr.vmem [resolvable:$true] %s417_s5 }
  0x5a   :  { %470 = vmatprep.subr.bf16.mxu1 %v469_v49  ;;  %v208_v4 = vrot.slane %v195_v2, %v207_v1  ;;  %v212_v5 = vrot.slane %v195_v2, %v211_v3  ;;  %v200_v29 = vrot.slane %v195_v2, %v199_v24  ;;  %v204_v32 = vrot.slane %v195_v2, %v203_v25  ;;  %s597_s25 = scalar_lea.vmem %s418_s5, 256  ;;  %p602_p5 = scmp.lt.s32.totalorder %s418_s5, %s418_s5 }
  0x5b   :  { %p598_p4 = scmp.ne.s32.totalorder %s418_s5, %s597_s25  ;;  %p603_p6 = scmp.lt.s32.totalorder %s597_s25, %s597_s25 }
  0x5c   :  { %480 = vmatpush1.bf16.msra.mxu0 %v479_v41 }
  0x5d   :  { %482 = vmatprep.subr.bf16.mxu0 %v481_v42  ;;  %472 = vmatpush1.bf16.msra.mxu1 %v471_v54  ;;  %v399_v42 = vld [vmem:[#allocation5] sm:$0xff]  ;;  %p604_p7 = por %p603_p6, %p602_p5 }
  0x5f   :  { %p605_p8 = pnand %p604_p7, %p598_p4 }
  0x60   :  { %484 = vmatpush1.bf16.msra.mxu0 %v483_v45 }
  0x61   :  { %486 = vmatprep.subr.bf16.mxu0 %v485_v53 }
  0x64   :  { %488 = vmatpush1.bf16.msra.mxu0 %v487_v57 }
 0x12a   :  { %v158_v59 = vpop.f32.mrb[0].mxu0 }
 0x12b   :  { %v159_v60 = vadd.f32 %v428_v58, %v158_v59  ;;  %v450_v61 = vpop.f32.mrb[1].mxu0 }
 0x12d   :  { %v162_v62 = vmax.f32 %v159_v60, 0.0 }
 0x12f   :  { %430 = vmatmul.mubr.msk.f32.vlgmr.msra.gmra.mrb[0].mxu1 %vm217_vm2, %v162_v62  ;;  %431 = vmatmul.mubr.msk.f32.vlgmr.msra.gmra.mrb[2].mxu0 %vm217_vm2, %v162_v62 }
 0x202   :  { %v287_v6 = vpop.f32.mrb[0].mxu1  ;;  %v358_v7 = vpop.f32.mrb[2].mxu0 }
 0x203   :  { %v359_v8 = vadd.f32 %v358_v7, %v208_v4  ;;  %v289_v9 = vpop.f32.mrb[1].mxu1  ;;  %v360_v10 = vpop.f32.mrb[3].mxu0  ;;  %v288_v39 = vadd.f32 %v287_v6, %v200_v29 }
 0x204   :  { %v361_v11 = vadd.f32 %v360_v10, %v212_v5  ;;  %v290_v44 = vadd.f32 %v289_v9, %v204_v32 }
 0x205   :  { %v369_v12 = vand.u32 2147483647, %v359_v8  ;;  %v363_v36 = vmax.f32 %v359_v8, 0.0  ;;  %vm365_vm5 = vcmp.ne.f32.partialorder %v359_v8, %v359_v8  ;;  %v401_v49 = vsub.f32 %v399_v42, %v288_v39 }
 0x206   :  { %v370_v13 = vand.u32 2147483647, %v361_v11  ;;  %v364_v41 = vmax.f32 %v361_v11, 0.0  ;;  %vm366_vm6 = vcmp.ne.f32.partialorder %v361_v11, %v361_v11  ;;  %v402_v52 = vsub.f32 %v400_v46, %v290_v44 }
 0x207   :  { %v371_v14 = vsub.f32 0.0, %v369_v12 }
 0x208   :  { %v372_v15 = vsub.f32 0.0, %v370_v13 }
 0x209   :  { %v373_v16 = vmul.f32 1.442695, %v371_v14 }
 0x20a   :  { %v375_v17 = vmul.f32 1.442695, %v372_v15 }
 0x20b   :  { %501 = vpow2.f32 %v373_v16 }
 0x20c   :  { %503 = vpow2.f32 %v375_v17 }
 0x215   :  { %v502_v18 = vpop.eup %501 }
 0x216   :  { %v504_v19 = vpop.eup %503  ;;  %v377_v20 = vadd.f32 1.0, %v502_v18  ;;  %v380_v22 = vmul.f32 -0.5, %v502_v18  ;;  %v383_v27 = vand.u32 2147483647, %v502_v18 }
 0x217   :  { %v386_v21 = vadd.f32 1.0, %v504_v19  ;;  %v389_v23 = vmul.f32 -0.5, %v504_v19  ;;  %v392_v30 = vand.u32 2147483647, %v504_v19 }
 0x218   :  { %505 = vlog2.f32 %v377_v20  ;;  %v381_v26 = vadd.f32 1.0, %v380_v22  ;;  %vm384_vm3 = vcmp.lt.f32.partialorder %v383_v27, 0.0004427343 }
 0x219   :  { %507 = vlog2.f32 %v386_v21  ;;  %v390_v28 = vadd.f32 1.0, %v389_v23  ;;  %vm393_vm4 = vcmp.lt.f32.partialorder %v392_v30, 0.0004427343 }
 0x21a   :  { %v382_v35 = vmul.f32 %v502_v18, %v381_v26 }
 0x21b   :  { %v391_v38 = vmul.f32 %v504_v19, %v390_v28 }
 0x222   :  { %v506_v31 = vpop.eup %505 }
 0x223   :  { %v508_v33 = vpop.eup %507  ;;  %v379_v34 = vmul.f32 0.6931472, %v506_v31 }
 0x224   :  { %v388_v37 = vmul.f32 0.6931472, %v508_v33 }
 0x225   :  { %v385_v40 = vsel %vm384_vm3, %v382_v35, %v379_v34 }
 0x226   :  { %v395_v43 = vadd.f32 %v385_v40, %v363_v36  ;;  %v394_v45 = vsel %vm393_vm4, %v391_v38, %v388_v37 }
 0x227   :  { %v396_v47 = vadd.f32 %v394_v45, %v364_v41 }
 0x228   :  { %v397_v48 = vsel %vm365_vm5, %v359_v8, %v395_v43 }
 0x229   :  { %v403_v50 = vsub.f32 0.0, %v397_v48  ;;  %v398_v51 = vsel %vm366_vm6, %v361_v11, %v396_v47 }
 0x22a   :  { %v404_v53 = vsub.f32 0.0, %v398_v51 }
 0x22b   :  { %v405_v54 = vmul.f32 %v403_v50, %v401_v49 }
 0x22c   :  { %v406_v55 = vmul.f32 %v404_v53, %v402_v52 }
 0x22d   :  { %v407_v56 = vmul.f32 %v405_v54, %v401_v49 }
 0x22e   :  { %v408_v57 = vmul.f32 %v406_v55, %v402_v52 }
 0x22f   :  { %409 = vst [vmem:[#allocation10] sm:$0xff] %v407_v56 }
 0x230   :  { %410 = vst [vmem:[#allocation10 + $0x8] sm:$0xff] %v408_v57 }
 0x231   :  { %608 = shalt.err (!%p605_p8)
}
 0x232   :  { %s609_s28 = scalar_lea.hbm %s746_s6, 256 }
 0x233   :  { %p610_p9 = scmp.ne.s32.totalorder %s746_s6, %s609_s28  ;;  %p613_p10 = scmp.lt.u32.totalorder %s609_s28, %s746_s6 }
 0x235   :  { %p615_p11 = pnand %p613_p10, %p610_p9 }
 0x237   :  { %618 = shalt.err (!%p615_p11)
}
 0x238   :  { %420 = dma.vmem_to_hbm [thread:$0]  %s418_s5, 256, %s746_s6, [#allocation4]  }
 0x239   :  { %625 = dma.done.wait [#allocation4], 256  }
 0x23a   :  { %626 = vsyncadd [#allocation4], 4294967040 }
 0x23b   :  { %424 = vsyncpa [#allocation3], 1 }
 0x23c   :  { %425 = vsyncpa [#allocation6], 1 }
 0x23d   :  { %426 = vsyncpa [#allocation9], 1 }
 0x23e   :  { %427 = vsyncpa [#allocation4], 1 }

</bundles_post_ra>
